<compile_context>
chip_gen: v7x
topology: tpu7x:2x2x1
jax: 0.10.0
libtpu: 0.0.40
codegen_flags: <defaults>
</compile_context>

<pallas_src>
import numpy as np
import jax
import jax.numpy as jnp
from jax.experimental import pallas as pl
from jax.experimental.pallas import tpu as pltpu


def attention_model_kernel(x_ref, wih_ref, whh_ref, b_ref, wl_ref, bl_ref,
                           logits_ref, attn_ref):
    """Single program; the whole (tiny) problem is resident in VMEM."""
    B, S = attn_ref.shape
    H = whh_ref.shape[0]

    wih = wih_ref[...]                        # (E, 4H)  bf16
    whh = whh_ref[...]                        # (H, 4H)  bf16
    b = b_ref[...]                            # (1, 4H)  f32 (= b_ih + b_hh)

    # ---- Hoisted input projection: one MXU matmul for all S timesteps. ----
    xw = jnp.dot(x_ref[...], wih, preferred_element_type=jnp.float32) + b   # (S*B, 4H) f32

    # Hoisted lane mask selecting the g-gate block [2H, 3H) of the 4H gate lanes.
    lane = jax.lax.broadcasted_iota(jnp.int32, (B, 4 * H), 1)
    g_mask = (lane >= 2 * H) & (lane < 3 * H)

    h = jnp.zeros((B, H), jnp.float32)
    c = jnp.zeros((B, H), jnp.float32)
    hs = []
    # Statically unrolled recurrence (the serial critical path).
    for s in range(S):
        pre = xw[s * B:(s + 1) * B, :] + jnp.dot(
            h.astype(whh.dtype), whh, preferred_element_type=jnp.float32)   # (B, 4H) f32
        # One EUP pass over the whole gate vreg: sigmoid for i/f/o lanes,
        # tanh for g lanes via tanh(x) = 2*sigmoid(2x) - 1.
        z = jnp.where(g_mask, pre + pre, pre)
        sg = jax.nn.sigmoid(z)
        acts = jnp.where(g_mask, sg + sg - 1.0, sg)
        i_g = acts[:, 0 * H:1 * H]
        f_g = acts[:, 1 * H:2 * H]
        g_g = acts[:, 2 * H:3 * H]
        o_g = acts[:, 3 * H:4 * H]
        c = f_g * c + i_g * g_g
        h = o_g * jnp.tanh(c)
        hs.append(h)                          # stays in vregs; no VMEM scratch

    h_final = h                               # (B, H)

    # ---- Attention against the final hidden state, built directly in (B, S). ----
    col_idx = jax.lax.broadcasted_iota(jnp.int32, (B, S), 1)
    scores = jnp.zeros((B, S), jnp.float32)
    for s in range(S):
        col = jnp.sum(hs[s] * h_final, axis=1, keepdims=True)               # (B, 1)
        scores = jnp.where(col_idx == s, col, scores)                        # (B, S)

    m = jnp.max(scores, axis=1, keepdims=True)
    e = jnp.exp(scores - m)
    inv = pl.reciprocal(jnp.sum(e, axis=1, keepdims=True), approx=True)
    soft = e * inv                                                           # softmax over S

    new_hidden = jnp.zeros((B, H), jnp.float32)
    for s in range(S):
        new_hidden = new_hidden + soft[:, s:s + 1] * hs[s]                   # (B, H) context

    logits_ref[...] = (jnp.dot(new_hidden.astype(wl_ref.dtype), wl_ref[...],
                               preferred_element_type=jnp.float32)
                       + bl_ref[...])                                        # (B, O)
    attn_ref[...] = soft                                                     # (B, S)


@jax.jit
def attention_model_forward(x_bse, params):
    """x_bse: (batch, seq, embedding) — same calling convention as the torch module."""
    B, S, E = x_bse.shape
    H = params["w_hh"].shape[1]
    O = params["w_label"].shape[0]

    # Time-major, flattened to (S*B, E) so the input projection is a single matmul.
    x2d = jnp.transpose(x_bse, (1, 0, 2)).reshape(S * B, E).astype(jnp.bfloat16)
    wih_t = params["w_ih"].T.astype(jnp.bfloat16)                            # (E, 4H)
    whh_t = params["w_hh"].T.astype(jnp.bfloat16)                            # (H, 4H)
    b = (params["b_ih"] + params["b_hh"]).reshape(1, 4 * H).astype(jnp.float32)
    wl_t = params["w_label"].T.astype(jnp.bfloat16)                          # (H, O)
    bl = params["b_label"].reshape(1, O).astype(jnp.float32)

    vmem = pl.BlockSpec(memory_space=pltpu.MemorySpace.VMEM)
    logits, attn = pl.pallas_call(
        attention_model_kernel,
        out_shape=(jax.ShapeDtypeStruct((B, O), jnp.float32),
                   jax.ShapeDtypeStruct((B, S), jnp.float32)),
        in_specs=[vmem] * 6,
        out_specs=(vmem, vmem),
    )(x2d, wih_t, whh_t, b, wl_t, bl)
    return logits, attn                       # (B, O), (B, S) — PyTorch layouts


def init_params(key, E, H, O):
    """Deterministic synthetic parameters, PyTorch-style uniform(-1/sqrt(H), 1/sqrt(H))."""
    k = 1.0 / np.sqrt(H)
    ks = jax.random.split(key, 6)
    return {
        "w_ih":    jax.random.uniform(ks[0], (4 * H, E), jnp.float32, -k, k),
        "w_hh":    jax.random.uniform(ks[1], (4 * H, H), jnp.float32, -k, k),
        "b_ih":    jax.random.uniform(ks[2], (4 * H,),   jnp.float32, -k, k),
        "b_hh":    jax.random.uniform(ks[3], (4 * H,),   jnp.float32, -k, k),
        "w_label": jax.random.uniform(ks[4], (O, H),     jnp.float32, -k, k),
        "b_label": jax.random.uniform(ks[5], (O,),       jnp.float32, -k, k),
    }


def reference_forward(x_bse, params):
    """Pure-JAX f32 reference mirroring the PyTorch forward exactly."""
    B, S, E = x_bse.shape
    H = params["w_hh"].shape[1]
    x_sbe = jnp.transpose(x_bse, (1, 0, 2))
    wih_t, whh_t = params["w_ih"].T, params["w_hh"].T
    b = params["b_ih"] + params["b_hh"]

    def step(carry, x_t):
        h, c = carry
        gates = x_t @ wih_t + h @ whh_t + b
        i = jax.nn.sigmoid(gates[:, :H])
        f = jax.nn.sigmoid(gates[:, H:2 * H])
        g = jnp.tanh(gates[:, 2 * H:3 * H])
        o = jax.nn.sigmoid(gates[:, 3 * H:4 * H])
        c = f * c + i * g
        h = o * jnp.tanh(c)
        return (h, c), h

    (h_final, _), outs = jax.lax.scan(
        step, (jnp.zeros((B, H), jnp.float32), jnp.zeros((B, H), jnp.float32)), x_sbe)
    out_bsh = jnp.transpose(outs, (1, 0, 2))                    # (B, S, H)
    scores = jnp.einsum("bsh,bh->bs", out_bsh, h_final)
    soft = jax.nn.softmax(scores, axis=1)
    new_hidden = jnp.einsum("bsh,bs->bh", out_bsh, soft)
    logits = new_hidden @ params["w_label"].T + params["b_label"]
    return logits, soft


if __name__ == "__main__":
    # batch=2, seq=8, embedding=32, hidden=32, output=4
    B, S, E, H, O = 2, 8, 32, 32, 4
    key = jax.random.PRNGKey(0)
    kx, kp = jax.random.split(key)
    x = jax.random.normal(kx, (B, S, E), jnp.float32)
    params = init_params(kp, E, H, O)

    logits, attn = attention_model_forward(x, params)
    jax.block_until_ready((logits, attn))

    ref_logits, ref_attn = reference_forward(x, params)
    assert logits.shape == (B, O) and attn.shape == (B, S)
    # Tolerances cover the bf16 matmul operands + approx EUP reciprocal.
    assert np.allclose(np.asarray(logits), np.asarray(ref_logits), rtol=2e-2, atol=2e-2)
    assert np.allclose(np.asarray(attn), np.asarray(ref_attn), rtol=2e-2, atol=2e-2)

    print("KERNEL_OK")
</pallas_src>

<mosaic_0001>
module attributes {stable_mosaic.version = 11 : i64} {
  func.func @attention_model_kernel(%arg0: memref<16x32xbf16, #tpu.memory_space<vmem>>, %arg1: memref<32x128xbf16, #tpu.memory_space<vmem>>, %arg2: memref<32x128xbf16, #tpu.memory_space<vmem>>, %arg3: memref<1x128xf32, #tpu.memory_space<vmem>>, %arg4: memref<32x4xbf16, #tpu.memory_space<vmem>>, %arg5: memref<1x4xf32, #tpu.memory_space<vmem>>, %arg6: memref<2x4xf32, #tpu.memory_space<vmem>>, %arg7: memref<2x8xf32, #tpu.memory_space<vmem>>) attributes {dimension_semantics = [], scalar_prefetch = 0 : i64, scratch_operands = 0 : i64, tpu.core_type = #tpu.core_type<tc>} {
    %c0 = arith.constant 0 : index
    %c0_0 = arith.constant 0 : index
    %0 = vector.load %arg1[%c0, %c0_0] : memref<32x128xbf16, #tpu.memory_space<vmem>>, vector<32x128xbf16>
    %c0_1 = arith.constant 0 : index
    %c0_2 = arith.constant 0 : index
    %1 = vector.load %arg2[%c0_1, %c0_2] : memref<32x128xbf16, #tpu.memory_space<vmem>>, vector<32x128xbf16>
    %c0_3 = arith.constant 0 : index
    %c0_4 = arith.constant 0 : index
    %2 = vector.load %arg3[%c0_3, %c0_4] : memref<1x128xf32, #tpu.memory_space<vmem>>, vector<1x128xf32>
    %c0_5 = arith.constant 0 : index
    %c0_6 = arith.constant 0 : index
    %3 = vector.load %arg0[%c0_5, %c0_6] : memref<16x32xbf16, #tpu.memory_space<vmem>>, vector<16x32xbf16>
    %cst = arith.constant dense<0.000000e+00> : vector<16x128xf32>
    %4 = tpu.matmul %3, %0, %cst {dimension_numbers = #tpu.dot_dimension_numbers<[1], [0], [0], [1], [0, 0, 1, 1], [], []>} : vector<16x32xbf16>, vector<32x128xbf16>, vector<16x128xf32> -> vector<16x128xf32>
    %5 = vector.broadcast %2 : vector<1x128xf32> to vector<16x128xf32>
    %6 = arith.addf %4, %5 : vector<16x128xf32>
    %7 = tpu.iota {dimensions = array<i32: 1>} : vector<2x128xi32>
    %c64_i32 = arith.constant 64 : i32
    %8 = vector.broadcast %c64_i32 : i32 to vector<2x128xi32>
    %9 = arith.cmpi sge, %7, %8 : vector<2x128xi32>
    %c96_i32 = arith.constant 96 : i32
    %10 = vector.broadcast %c96_i32 : i32 to vector<2x128xi32>
    %11 = arith.cmpi slt, %7, %10 : vector<2x128xi32>
    %12 = arith.andi %9, %11 : vector<2x128xi1>
    %cst_7 = arith.constant 0.000000e+00 : f32
    %13 = vector.broadcast %cst_7 : f32 to vector<2x32xf32>
    %cst_8 = arith.constant 0.000000e+00 : f32
    %14 = vector.broadcast %cst_8 : f32 to vector<2x32xf32>
    %15 = vector.extract_strided_slice %6 {offsets = [0, 0], sizes = [2, 128], strides = [1, 1]} : vector<16x128xf32> to vector<2x128xf32>
    %16 = arith.truncf %13 : vector<2x32xf32> to vector<2x32xbf16>
    %cst_9 = arith.constant dense<0.000000e+00> : vector<2x128xf32>
    %17 = tpu.matmul %16, %1, %cst_9 {dimension_numbers = #tpu.dot_dimension_numbers<[1], [0], [0], [1], [0, 0, 1, 1], [], []>} : vector<2x32xbf16>, vector<32x128xbf16>, vector<2x128xf32> -> vector<2x128xf32>
    %18 = arith.addf %15, %17 : vector<2x128xf32>
    %19 = arith.addf %18, %18 : vector<2x128xf32>
    %20 = arith.select %12, %19, %18 : vector<2x128xi1>, vector<2x128xf32>
    %21 = arith.negf %20 : vector<2x128xf32>
    %22 = math.exp %21 : vector<2x128xf32>
    %cst_10 = arith.constant 1.000000e+00 : f32
    %23 = vector.broadcast %cst_10 : f32 to vector<2x128xf32>
    %24 = arith.addf %23, %22 : vector<2x128xf32>
    %25 = arith.divf %23, %24 : vector<2x128xf32>
    %26 = arith.addf %25, %25 : vector<2x128xf32>
    %cst_11 = arith.constant 1.000000e+00 : f32
    %27 = vector.broadcast %cst_11 : f32 to vector<2x128xf32>
    %28 = arith.subf %26, %27 : vector<2x128xf32>
    %29 = arith.select %12, %28, %25 : vector<2x128xi1>, vector<2x128xf32>
    %30 = vector.extract_strided_slice %29 {offsets = [0, 0], sizes = [2, 32], strides = [1, 1]} : vector<2x128xf32> to vector<2x32xf32>
    %31 = vector.extract_strided_slice %29 {offsets = [0, 32], sizes = [2, 32], strides = [1, 1]} : vector<2x128xf32> to vector<2x32xf32>
    %32 = vector.extract_strided_slice %29 {offsets = [0, 64], sizes = [2, 32], strides = [1, 1]} : vector<2x128xf32> to vector<2x32xf32>
    %33 = vector.extract_strided_slice %29 {offsets = [0, 96], sizes = [2, 32], strides = [1, 1]} : vector<2x128xf32> to vector<2x32xf32>
    %34 = arith.mulf %31, %14 : vector<2x32xf32>
    %35 = arith.mulf %30, %32 : vector<2x32xf32>
    %36 = arith.addf %34, %35 : vector<2x32xf32>
    %37 = math.tanh %36 : vector<2x32xf32>
    %38 = arith.mulf %33, %37 : vector<2x32xf32>
    %39 = vector.extract_strided_slice %6 {offsets = [2, 0], sizes = [2, 128], strides = [1, 1]} : vector<16x128xf32> to vector<2x128xf32>
    %40 = arith.truncf %38 : vector<2x32xf32> to vector<2x32xbf16>
    %cst_12 = arith.constant dense<0.000000e+00> : vector<2x128xf32>
    %41 = tpu.matmul %40, %1, %cst_12 {dimension_numbers = #tpu.dot_dimension_numbers<[1], [0], [0], [1], [0, 0, 1, 1], [], []>} : vector<2x32xbf16>, vector<32x128xbf16>, vector<2x128xf32> -> vector<2x128xf32>
    %42 = arith.addf %39, %41 : vector<2x128xf32>
    %43 = arith.addf %42, %42 : vector<2x128xf32>
    %44 = arith.select %12, %43, %42 : vector<2x128xi1>, vector<2x128xf32>
    %45 = arith.negf %44 : vector<2x128xf32>
    %46 = math.exp %45 : vector<2x128xf32>
    %cst_13 = arith.constant 1.000000e+00 : f32
    %47 = vector.broadcast %cst_13 : f32 to vector<2x128xf32>
    %48 = arith.addf %47, %46 : vector<2x128xf32>
    %49 = arith.divf %47, %48 : vector<2x128xf32>
    %50 = arith.addf %49, %49 : vector<2x128xf32>
    %cst_14 = arith.constant 1.000000e+00 : f32
    %51 = vector.broadcast %cst_14 : f32 to vector<2x128xf32>
    %52 = arith.subf %50, %51 : vector<2x128xf32>
    %53 = arith.select %12, %52, %49 : vector<2x128xi1>, vector<2x128xf32>
    %54 = vector.extract_strided_slice %53 {offsets = [0, 0], sizes = [2, 32], strides = [1, 1]} : vector<2x128xf32> to vector<2x32xf32>
    %55 = vector.extract_strided_slice %53 {offsets = [0, 32], sizes = [2, 32], strides = [1, 1]} : vector<2x128xf32> to vector<2x32xf32>
    %56 = vector.extract_strided_slice %53 {offsets = [0, 64], sizes = [2, 32], strides = [1, 1]} : vector<2x128xf32> to vector<2x32xf32>
    %57 = vector.extract_strided_slice %53 {offsets = [0, 96], sizes = [2, 32], strides = [1, 1]} : vector<2x128xf32> to vector<2x32xf32>
    %58 = arith.mulf %55, %36 : vector<2x32xf32>
    %59 = arith.mulf %54, %56 : vector<2x32xf32>
    %60 = arith.addf %58, %59 : vector<2x32xf32>
    %61 = math.tanh %60 : vector<2x32xf32>
    %62 = arith.mulf %57, %61 : vector<2x32xf32>
    %63 = vector.extract_strided_slice %6 {offsets = [4, 0], sizes = [2, 128], strides = [1, 1]} : vector<16x128xf32> to vector<2x128xf32>
    %64 = arith.truncf %62 : vector<2x32xf32> to vector<2x32xbf16>
    %cst_15 = arith.constant dense<0.000000e+00> : vector<2x128xf32>
    %65 = tpu.matmul %64, %1, %cst_15 {dimension_numbers = #tpu.dot_dimension_numbers<[1], [0], [0], [1], [0, 0, 1, 1], [], []>} : vector<2x32xbf16>, vector<32x128xbf16>, vector<2x128xf32> -> vector<2x128xf32>
    %66 = arith.addf %63, %65 : vector<2x128xf32>
    %67 = arith.addf %66, %66 : vector<2x128xf32>
    %68 = arith.select %12, %67, %66 : vector<2x128xi1>, vector<2x128xf32>
    %69 = arith.negf %68 : vector<2x128xf32>
    %70 = math.exp %69 : vector<2x128xf32>
    %cst_16 = arith.constant 1.000000e+00 : f32
    %71 = vector.broadcast %cst_16 : f32 to vector<2x128xf32>
    %72 = arith.addf %71, %70 : vector<2x128xf32>
    %73 = arith.divf %71, %72 : vector<2x128xf32>
    %74 = arith.addf %73, %73 : vector<2x128xf32>
    %cst_17 = arith.constant 1.000000e+00 : f32
    %75 = vector.broadcast %cst_17 : f32 to vector<2x128xf32>
    %76 = arith.subf %74, %75 : vector<2x128xf32>
    %77 = arith.select %12, %76, %73 : vector<2x128xi1>, vector<2x128xf32>
    %78 = vector.extract_strided_slice %77 {offsets = [0, 0], sizes = [2, 32], strides = [1, 1]} : vector<2x128xf32> to vector<2x32xf32>
    %79 = vector.extract_strided_slice %77 {offsets = [0, 32], sizes = [2, 32], strides = [1, 1]} : vector<2x128xf32> to vector<2x32xf32>
    %80 = vector.extract_strided_slice %77 {offsets = [0, 64], sizes = [2, 32], strides = [1, 1]} : vector<2x128xf32> to vector<2x32xf32>
    %81 = vector.extract_strided_slice %77 {offsets = [0, 96], sizes = [2, 32], strides = [1, 1]} : vector<2x128xf32> to vector<2x32xf32>
    %82 = arith.mulf %79, %60 : vector<2x32xf32>
    %83 = arith.mulf %78, %80 : vector<2x32xf32>
    %84 = arith.addf %82, %83 : vector<2x32xf32>
    %85 = math.tanh %84 : vector<2x32xf32>
    %86 = arith.mulf %81, %85 : vector<2x32xf32>
    %87 = vector.extract_strided_slice %6 {offsets = [6, 0], sizes = [2, 128], strides = [1, 1]} : vector<16x128xf32> to vector<2x128xf32>
    %88 = arith.truncf %86 : vector<2x32xf32> to vector<2x32xbf16>
    %cst_18 = arith.constant dense<0.000000e+00> : vector<2x128xf32>
    %89 = tpu.matmul %88, %1, %cst_18 {dimension_numbers = #tpu.dot_dimension_numbers<[1], [0], [0], [1], [0, 0, 1, 1], [], []>} : vector<2x32xbf16>, vector<32x128xbf16>, vector<2x128xf32> -> vector<2x128xf32>
    %90 = arith.addf %87, %89 : vector<2x128xf32>
    %91 = arith.addf %90, %90 : vector<2x128xf32>
    %92 = arith.select %12, %91, %90 : vector<2x128xi1>, vector<2x128xf32>
    %93 = arith.negf %92 : vector<2x128xf32>
    %94 = math.exp %93 : vector<2x128xf32>
    %cst_19 = arith.constant 1.000000e+00 : f32
    %95 = vector.broadcast %cst_19 : f32 to vector<2x128xf32>
    %96 = arith.addf %95, %94 : vector<2x128xf32>
    %97 = arith.divf %95, %96 : vector<2x128xf32>
    %98 = arith.addf %97, %97 : vector<2x128xf32>
    %cst_20 = arith.constant 1.000000e+00 : f32
    %99 = vector.broadcast %cst_20 : f32 to vector<2x128xf32>
    %100 = arith.subf %98, %99 : vector<2x128xf32>
    %101 = arith.select %12, %100, %97 : vector<2x128xi1>, vector<2x128xf32>
    %102 = vector.extract_strided_slice %101 {offsets = [0, 0], sizes = [2, 32], strides = [1, 1]} : vector<2x128xf32> to vector<2x32xf32>
    %103 = vector.extract_strided_slice %101 {offsets = [0, 32], sizes = [2, 32], strides = [1, 1]} : vector<2x128xf32> to vector<2x32xf32>
    %104 = vector.extract_strided_slice %101 {offsets = [0, 64], sizes = [2, 32], strides = [1, 1]} : vector<2x128xf32> to vector<2x32xf32>
    %105 = vector.extract_strided_slice %101 {offsets = [0, 96], sizes = [2, 32], strides = [1, 1]} : vector<2x128xf32> to vector<2x32xf32>
    %106 = arith.mulf %103, %84 : vector<2x32xf32>
    %107 = arith.mulf %102, %104 : vector<2x32xf32>
    %108 = arith.addf %106, %107 : vector<2x32xf32>
    %109 = math.tanh %108 : vector<2x32xf32>
    %110 = arith.mulf %105, %109 : vector<2x32xf32>
    %111 = vector.extract_strided_slice %6 {offsets = [8, 0], sizes = [2, 128], strides = [1, 1]} : vector<16x128xf32> to vector<2x128xf32>
    %112 = arith.truncf %110 : vector<2x32xf32> to vector<2x32xbf16>
    %cst_21 = arith.constant dense<0.000000e+00> : vector<2x128xf32>
    %113 = tpu.matmul %112, %1, %cst_21 {dimension_numbers = #tpu.dot_dimension_numbers<[1], [0], [0], [1], [0, 0, 1, 1], [], []>} : vector<2x32xbf16>, vector<32x128xbf16>, vector<2x128xf32> -> vector<2x128xf32>
    %114 = arith.addf %111, %113 : vector<2x128xf32>
    %115 = arith.addf %114, %114 : vector<2x128xf32>
    %116 = arith.select %12, %115, %114 : vector<2x128xi1>, vector<2x128xf32>
    %117 = arith.negf %116 : vector<2x128xf32>
    %118 = math.exp %117 : vector<2x128xf32>
    %cst_22 = arith.constant 1.000000e+00 : f32
    %119 = vector.broadcast %cst_22 : f32 to vector<2x128xf32>
    %120 = arith.addf %119, %118 : vector<2x128xf32>
    %121 = arith.divf %119, %120 : vector<2x128xf32>
    %122 = arith.addf %121, %121 : vector<2x128xf32>
    %cst_23 = arith.constant 1.000000e+00 : f32
    %123 = vector.broadcast %cst_23 : f32 to vector<2x128xf32>
    %124 = arith.subf %122, %123 : vector<2x128xf32>
    %125 = arith.select %12, %124, %121 : vector<2x128xi1>, vector<2x128xf32>
    %126 = vector.extract_strided_slice %125 {offsets = [0, 0], sizes = [2, 32], strides = [1, 1]} : vector<2x128xf32> to vector<2x32xf32>
    %127 = vector.extract_strided_slice %125 {offsets = [0, 32], sizes = [2, 32], strides = [1, 1]} : vector<2x128xf32> to vector<2x32xf32>
    %128 = vector.extract_strided_slice %125 {offsets = [0, 64], sizes = [2, 32], strides = [1, 1]} : vector<2x128xf32> to vector<2x32xf32>
    %129 = vector.extract_strided_slice %125 {offsets = [0, 96], sizes = [2, 32], strides = [1, 1]} : vector<2x128xf32> to vector<2x32xf32>
    %130 = arith.mulf %127, %108 : vector<2x32xf32>
    %131 = arith.mulf %126, %128 : vector<2x32xf32>
    %132 = arith.addf %130, %131 : vector<2x32xf32>
    %133 = math.tanh %132 : vector<2x32xf32>
    %134 = arith.mulf %129, %133 : vector<2x32xf32>
    %135 = vector.extract_strided_slice %6 {offsets = [10, 0], sizes = [2, 128], strides = [1, 1]} : vector<16x128xf32> to vector<2x128xf32>
    %136 = arith.truncf %134 : vector<2x32xf32> to vector<2x32xbf16>
    %cst_24 = arith.constant dense<0.000000e+00> : vector<2x128xf32>
    %137 = tpu.matmul %136, %1, %cst_24 {dimension_numbers = #tpu.dot_dimension_numbers<[1], [0], [0], [1], [0, 0, 1, 1], [], []>} : vector<2x32xbf16>, vector<32x128xbf16>, vector<2x128xf32> -> vector<2x128xf32>
    %138 = arith.addf %135, %137 : vector<2x128xf32>
    %139 = arith.addf %138, %138 : vector<2x128xf32>
    %140 = arith.select %12, %139, %138 : vector<2x128xi1>, vector<2x128xf32>
    %141 = arith.negf %140 : vector<2x128xf32>
    %142 = math.exp %141 : vector<2x128xf32>
    %cst_25 = arith.constant 1.000000e+00 : f32
    %143 = vector.broadcast %cst_25 : f32 to vector<2x128xf32>
    %144 = arith.addf %143, %142 : vector<2x128xf32>
    %145 = arith.divf %143, %144 : vector<2x128xf32>
    %146 = arith.addf %145, %145 : vector<2x128xf32>
    %cst_26 = arith.constant 1.000000e+00 : f32
    %147 = vector.broadcast %cst_26 : f32 to vector<2x128xf32>
    %148 = arith.subf %146, %147 : vector<2x128xf32>
    %149 = arith.select %12, %148, %145 : vector<2x128xi1>, vector<2x128xf32>
    %150 = vector.extract_strided_slice %149 {offsets = [0, 0], sizes = [2, 32], strides = [1, 1]} : vector<2x128xf32> to vector<2x32xf32>
    %151 = vector.extract_strided_slice %149 {offsets = [0, 32], sizes = [2, 32], strides = [1, 1]} : vector<2x128xf32> to vector<2x32xf32>
    %152 = vector.extract_strided_slice %149 {offsets = [0, 64], sizes = [2, 32], strides = [1, 1]} : vector<2x128xf32> to vector<2x32xf32>
    %153 = vector.extract_strided_slice %149 {offsets = [0, 96], sizes = [2, 32], strides = [1, 1]} : vector<2x128xf32> to vector<2x32xf32>
    %154 = arith.mulf %151, %132 : vector<2x32xf32>
    %155 = arith.mulf %150, %152 : vector<2x32xf32>
    %156 = arith.addf %154, %155 : vector<2x32xf32>
    %157 = math.tanh %156 : vector<2x32xf32>
    %158 = arith.mulf %153, %157 : vector<2x32xf32>
    %159 = vector.extract_strided_slice %6 {offsets = [12, 0], sizes = [2, 128], strides = [1, 1]} : vector<16x128xf32> to vector<2x128xf32>
    %160 = arith.truncf %158 : vector<2x32xf32> to vector<2x32xbf16>
    %cst_27 = arith.constant dense<0.000000e+00> : vector<2x128xf32>
    %161 = tpu.matmul %160, %1, %cst_27 {dimension_numbers = #tpu.dot_dimension_numbers<[1], [0], [0], [1], [0, 0, 1, 1], [], []>} : vector<2x32xbf16>, vector<32x128xbf16>, vector<2x128xf32> -> vector<2x128xf32>
    %162 = arith.addf %159, %161 : vector<2x128xf32>
    %163 = arith.addf %162, %162 : vector<2x128xf32>
    %164 = arith.select %12, %163, %162 : vector<2x128xi1>, vector<2x128xf32>
    %165 = arith.negf %164 : vector<2x128xf32>
    %166 = math.exp %165 : vector<2x128xf32>
    %cst_28 = arith.constant 1.000000e+00 : f32
    %167 = vector.broadcast %cst_28 : f32 to vector<2x128xf32>
    %168 = arith.addf %167, %166 : vector<2x128xf32>
    %169 = arith.divf %167, %168 : vector<2x128xf32>
    %170 = arith.addf %169, %169 : vector<2x128xf32>
    %cst_29 = arith.constant 1.000000e+00 : f32
    %171 = vector.broadcast %cst_29 : f32 to vector<2x128xf32>
    %172 = arith.subf %170, %171 : vector<2x128xf32>
    %173 = arith.select %12, %172, %169 : vector<2x128xi1>, vector<2x128xf32>
    %174 = vector.extract_strided_slice %173 {offsets = [0, 0], sizes = [2, 32], strides = [1, 1]} : vector<2x128xf32> to vector<2x32xf32>
    %175 = vector.extract_strided_slice %173 {offsets = [0, 32], sizes = [2, 32], strides = [1, 1]} : vector<2x128xf32> to vector<2x32xf32>
    %176 = vector.extract_strided_slice %173 {offsets = [0, 64], sizes = [2, 32], strides = [1, 1]} : vector<2x128xf32> to vector<2x32xf32>
    %177 = vector.extract_strided_slice %173 {offsets = [0, 96], sizes = [2, 32], strides = [1, 1]} : vector<2x128xf32> to vector<2x32xf32>
    %178 = arith.mulf %175, %156 : vector<2x32xf32>
    %179 = arith.mulf %174, %176 : vector<2x32xf32>
    %180 = arith.addf %178, %179 : vector<2x32xf32>
    %181 = math.tanh %180 : vector<2x32xf32>
    %182 = arith.mulf %177, %181 : vector<2x32xf32>
    %183 = vector.extract_strided_slice %6 {offsets = [14, 0], sizes = [2, 128], strides = [1, 1]} : vector<16x128xf32> to vector<2x128xf32>
    %184 = arith.truncf %182 : vector<2x32xf32> to vector<2x32xbf16>
    %cst_30 = arith.constant dense<0.000000e+00> : vector<2x128xf32>
    %185 = tpu.matmul %184, %1, %cst_30 {dimension_numbers = #tpu.dot_dimension_numbers<[1], [0], [0], [1], [0, 0, 1, 1], [], []>} : vector<2x32xbf16>, vector<32x128xbf16>, vector<2x128xf32> -> vector<2x128xf32>
    %186 = arith.addf %183, %185 : vector<2x128xf32>
    %187 = arith.addf %186, %186 : vector<2x128xf32>
    %188 = arith.select %12, %187, %186 : vector<2x128xi1>, vector<2x128xf32>
    %189 = arith.negf %188 : vector<2x128xf32>
    %190 = math.exp %189 : vector<2x128xf32>
    %cst_31 = arith.constant 1.000000e+00 : f32
    %191 = vector.broadcast %cst_31 : f32 to vector<2x128xf32>
    %192 = arith.addf %191, %190 : vector<2x128xf32>
    %193 = arith.divf %191, %192 : vector<2x128xf32>
    %194 = arith.addf %193, %193 : vector<2x128xf32>
    %cst_32 = arith.constant 1.000000e+00 : f32
    %195 = vector.broadcast %cst_32 : f32 to vector<2x128xf32>
    %196 = arith.subf %194, %195 : vector<2x128xf32>
    %197 = arith.select %12, %196, %193 : vector<2x128xi1>, vector<2x128xf32>
    %198 = vector.extract_strided_slice %197 {offsets = [0, 0], sizes = [2, 32], strides = [1, 1]} : vector<2x128xf32> to vector<2x32xf32>
    %199 = vector.extract_strided_slice %197 {offsets = [0, 32], sizes = [2, 32], strides = [1, 1]} : vector<2x128xf32> to vector<2x32xf32>
    %200 = vector.extract_strided_slice %197 {offsets = [0, 64], sizes = [2, 32], strides = [1, 1]} : vector<2x128xf32> to vector<2x32xf32>
    %201 = vector.extract_strided_slice %197 {offsets = [0, 96], sizes = [2, 32], strides = [1, 1]} : vector<2x128xf32> to vector<2x32xf32>
    %202 = arith.mulf %199, %180 : vector<2x32xf32>
    %203 = arith.mulf %198, %200 : vector<2x32xf32>
    %204 = arith.addf %202, %203 : vector<2x32xf32>
    %205 = math.tanh %204 : vector<2x32xf32>
    %206 = arith.mulf %201, %205 : vector<2x32xf32>
    %207 = tpu.iota {dimensions = array<i32: 1>} : vector<2x8xi32>
    %cst_33 = arith.constant 0.000000e+00 : f32
    %208 = vector.broadcast %cst_33 : f32 to vector<2x8xf32>
    %209 = arith.mulf %38, %206 : vector<2x32xf32>
    %cst_34 = arith.constant dense<0.000000e+00> : vector<2xf32>
    %210 = vector.multi_reduction <add>, %209, %cst_34 [1] : vector<2x32xf32> to vector<2xf32>
    %211 = vector.shape_cast %210 : vector<2xf32> to vector<2x1xf32>
    %c0_i32 = arith.constant 0 : i32
    %212 = vector.broadcast %c0_i32 : i32 to vector<2x8xi32>
    %213 = arith.cmpi eq, %207, %212 : vector<2x8xi32>
    %214 = vector.shape_cast %211 : vector<2x1xf32> to vector<2x1xf32>
    %215 = vector.broadcast %214 : vector<2x1xf32> to vector<2x8xf32>
    %216 = arith.select %213, %215, %208 : vector<2x8xi1>, vector<2x8xf32>
    %217 = arith.mulf %62, %206 : vector<2x32xf32>
    %cst_35 = arith.constant dense<0.000000e+00> : vector<2xf32>
    %218 = vector.multi_reduction <add>, %217, %cst_35 [1] : vector<2x32xf32> to vector<2xf32>
    %219 = vector.shape_cast %218 : vector<2xf32> to vector<2x1xf32>
    %c1_i32 = arith.constant 1 : i32
    %220 = vector.broadcast %c1_i32 : i32 to vector<2x8xi32>
    %221 = arith.cmpi eq, %207, %220 : vector<2x8xi32>
    %222 = vector.shape_cast %219 : vector<2x1xf32> to vector<2x1xf32>
    %223 = vector.broadcast %222 : vector<2x1xf32> to vector<2x8xf32>
    %224 = arith.select %221, %223, %216 : vector<2x8xi1>, vector<2x8xf32>
    %225 = arith.mulf %86, %206 : vector<2x32xf32>
    %cst_36 = arith.constant dense<0.000000e+00> : vector<2xf32>
    %226 = vector.multi_reduction <add>, %225, %cst_36 [1] : vector<2x32xf32> to vector<2xf32>
    %227 = vector.shape_cast %226 : vector<2xf32> to vector<2x1xf32>
    %c2_i32 = arith.constant 2 : i32
    %228 = vector.broadcast %c2_i32 : i32 to vector<2x8xi32>
    %229 = arith.cmpi eq, %207, %228 : vector<2x8xi32>
    %230 = vector.shape_cast %227 : vector<2x1xf32> to vector<2x1xf32>
    %231 = vector.broadcast %230 : vector<2x1xf32> to vector<2x8xf32>
    %232 = arith.select %229, %231, %224 : vector<2x8xi1>, vector<2x8xf32>
    %233 = arith.mulf %110, %206 : vector<2x32xf32>
    %cst_37 = arith.constant dense<0.000000e+00> : vector<2xf32>
    %234 = vector.multi_reduction <add>, %233, %cst_37 [1] : vector<2x32xf32> to vector<2xf32>
    %235 = vector.shape_cast %234 : vector<2xf32> to vector<2x1xf32>
    %c3_i32 = arith.constant 3 : i32
    %236 = vector.broadcast %c3_i32 : i32 to vector<2x8xi32>
    %237 = arith.cmpi eq, %207, %236 : vector<2x8xi32>
    %238 = vector.shape_cast %235 : vector<2x1xf32> to vector<2x1xf32>
    %239 = vector.broadcast %238 : vector<2x1xf32> to vector<2x8xf32>
    %240 = arith.select %237, %239, %232 : vector<2x8xi1>, vector<2x8xf32>
    %241 = arith.mulf %134, %206 : vector<2x32xf32>
    %cst_38 = arith.constant dense<0.000000e+00> : vector<2xf32>
    %242 = vector.multi_reduction <add>, %241, %cst_38 [1] : vector<2x32xf32> to vector<2xf32>
    %243 = vector.shape_cast %242 : vector<2xf32> to vector<2x1xf32>
    %c4_i32 = arith.constant 4 : i32
    %244 = vector.broadcast %c4_i32 : i32 to vector<2x8xi32>
    %245 = arith.cmpi eq, %207, %244 : vector<2x8xi32>
    %246 = vector.shape_cast %243 : vector<2x1xf32> to vector<2x1xf32>
    %247 = vector.broadcast %246 : vector<2x1xf32> to vector<2x8xf32>
    %248 = arith.select %245, %247, %240 : vector<2x8xi1>, vector<2x8xf32>
    %249 = arith.mulf %158, %206 : vector<2x32xf32>
    %cst_39 = arith.constant dense<0.000000e+00> : vector<2xf32>
    %250 = vector.multi_reduction <add>, %249, %cst_39 [1] : vector<2x32xf32> to vector<2xf32>
    %251 = vector.shape_cast %250 : vector<2xf32> to vector<2x1xf32>
    %c5_i32 = arith.constant 5 : i32
    %252 = vector.broadcast %c5_i32 : i32 to vector<2x8xi32>
    %253 = arith.cmpi eq, %207, %252 : vector<2x8xi32>
    %254 = vector.shape_cast %251 : vector<2x1xf32> to vector<2x1xf32>
    %255 = vector.broadcast %254 : vector<2x1xf32> to vector<2x8xf32>
    %256 = arith.select %253, %255, %248 : vector<2x8xi1>, vector<2x8xf32>
    %257 = arith.mulf %182, %206 : vector<2x32xf32>
    %cst_40 = arith.constant dense<0.000000e+00> : vector<2xf32>
    %258 = vector.multi_reduction <add>, %257, %cst_40 [1] : vector<2x32xf32> to vector<2xf32>
    %259 = vector.shape_cast %258 : vector<2xf32> to vector<2x1xf32>
    %c6_i32 = arith.constant 6 : i32
    %260 = vector.broadcast %c6_i32 : i32 to vector<2x8xi32>
    %261 = arith.cmpi eq, %207, %260 : vector<2x8xi32>
    %262 = vector.shape_cast %259 : vector<2x1xf32> to vector<2x1xf32>
    %263 = vector.broadcast %262 : vector<2x1xf32> to vector<2x8xf32>
    %264 = arith.select %261, %263, %256 : vector<2x8xi1>, vector<2x8xf32>
    %265 = arith.mulf %206, %206 : vector<2x32xf32>
    %cst_41 = arith.constant dense<0.000000e+00> : vector<2xf32>
    %266 = vector.multi_reduction <add>, %265, %cst_41 [1] : vector<2x32xf32> to vector<2xf32>
    %267 = vector.shape_cast %266 : vector<2xf32> to vector<2x1xf32>
    %c7_i32 = arith.constant 7 : i32
    %268 = vector.broadcast %c7_i32 : i32 to vector<2x8xi32>
    %269 = arith.cmpi eq, %207, %268 : vector<2x8xi32>
    %270 = vector.shape_cast %267 : vector<2x1xf32> to vector<2x1xf32>
    %271 = vector.broadcast %270 : vector<2x1xf32> to vector<2x8xf32>
    %272 = arith.select %269, %271, %264 : vector<2x8xi1>, vector<2x8xf32>
    %cst_42 = arith.constant dense<0xFF800000> : vector<2xf32>
    %273 = vector.multi_reduction <maximumf>, %272, %cst_42 [1] : vector<2x8xf32> to vector<2xf32>
    %274 = vector.shape_cast %273 : vector<2xf32> to vector<2x1xf32>
    %275 = vector.broadcast %274 : vector<2x1xf32> to vector<2x8xf32>
    %276 = arith.subf %272, %275 : vector<2x8xf32>
    %277 = math.exp %276 : vector<2x8xf32>
    %cst_43 = arith.constant dense<0.000000e+00> : vector<2xf32>
    %278 = vector.multi_reduction <add>, %277, %cst_43 [1] : vector<2x8xf32> to vector<2xf32>
    %279 = vector.shape_cast %278 : vector<2xf32> to vector<2x1xf32>
    %280 = tpu.reciprocal %279 {approx = true} : vector<2x1xf32> -> vector<2x1xf32>
    %281 = vector.broadcast %280 : vector<2x1xf32> to vector<2x8xf32>
    %282 = arith.mulf %277, %281 : vector<2x8xf32>
    %cst_44 = arith.constant 0.000000e+00 : f32
    %283 = vector.broadcast %cst_44 : f32 to vector<2x32xf32>
    %284 = vector.extract_strided_slice %282 {offsets = [0, 0], sizes = [2, 1], strides = [1, 1]} : vector<2x8xf32> to vector<2x1xf32>
    %285 = vector.broadcast %284 : vector<2x1xf32> to vector<2x32xf32>
    %286 = arith.mulf %285, %38 : vector<2x32xf32>
    %287 = arith.addf %283, %286 : vector<2x32xf32>
    %288 = vector.extract_strided_slice %282 {offsets = [0, 1], sizes = [2, 1], strides = [1, 1]} : vector<2x8xf32> to vector<2x1xf32>
    %289 = vector.broadcast %288 : vector<2x1xf32> to vector<2x32xf32>
    %290 = arith.mulf %289, %62 : vector<2x32xf32>
    %291 = arith.addf %287, %290 : vector<2x32xf32>
    %292 = vector.extract_strided_slice %282 {offsets = [0, 2], sizes = [2, 1], strides = [1, 1]} : vector<2x8xf32> to vector<2x1xf32>
    %293 = vector.broadcast %292 : vector<2x1xf32> to vector<2x32xf32>
    %294 = arith.mulf %293, %86 : vector<2x32xf32>
    %295 = arith.addf %291, %294 : vector<2x32xf32>
    %296 = vector.extract_strided_slice %282 {offsets = [0, 3], sizes = [2, 1], strides = [1, 1]} : vector<2x8xf32> to vector<2x1xf32>
    %297 = vector.broadcast %296 : vector<2x1xf32> to vector<2x32xf32>
    %298 = arith.mulf %297, %110 : vector<2x32xf32>
    %299 = arith.addf %295, %298 : vector<2x32xf32>
    %300 = vector.extract_strided_slice %282 {offsets = [0, 4], sizes = [2, 1], strides = [1, 1]} : vector<2x8xf32> to vector<2x1xf32>
    %301 = vector.broadcast %300 : vector<2x1xf32> to vector<2x32xf32>
    %302 = arith.mulf %301, %134 : vector<2x32xf32>
    %303 = arith.addf %299, %302 : vector<2x32xf32>
    %304 = vector.extract_strided_slice %282 {offsets = [0, 5], sizes = [2, 1], strides = [1, 1]} : vector<2x8xf32> to vector<2x1xf32>
    %305 = vector.broadcast %304 : vector<2x1xf32> to vector<2x32xf32>
    %306 = arith.mulf %305, %158 : vector<2x32xf32>
    %307 = arith.addf %303, %306 : vector<2x32xf32>
    %308 = vector.extract_strided_slice %282 {offsets = [0, 6], sizes = [2, 1], strides = [1, 1]} : vector<2x8xf32> to vector<2x1xf32>
    %309 = vector.broadcast %308 : vector<2x1xf32> to vector<2x32xf32>
    %310 = arith.mulf %309, %182 : vector<2x32xf32>
    %311 = arith.addf %307, %310 : vector<2x32xf32>
    %312 = vector.extract_strided_slice %282 {offsets = [0, 7], sizes = [2, 1], strides = [1, 1]} : vector<2x8xf32> to vector<2x1xf32>
    %313 = vector.broadcast %312 : vector<2x1xf32> to vector<2x32xf32>
    %314 = arith.mulf %313, %206 : vector<2x32xf32>
    %315 = arith.addf %311, %314 : vector<2x32xf32>
    %316 = arith.truncf %315 : vector<2x32xf32> to vector<2x32xbf16>
    %c0_45 = arith.constant 0 : index
    %c0_46 = arith.constant 0 : index
    %317 = vector.load %arg4[%c0_45, %c0_46] : memref<32x4xbf16, #tpu.memory_space<vmem>>, vector<32x4xbf16>
    %cst_47 = arith.constant dense<0.000000e+00> : vector<2x4xf32>
    %318 = tpu.matmul %316, %317, %cst_47 {dimension_numbers = #tpu.dot_dimension_numbers<[1], [0], [0], [1], [0, 0, 1, 1], [], []>} : vector<2x32xbf16>, vector<32x4xbf16>, vector<2x4xf32> -> vector<2x4xf32>
    %c0_48 = arith.constant 0 : index
    %c0_49 = arith.constant 0 : index
    %319 = vector.load %arg5[%c0_48, %c0_49] : memref<1x4xf32, #tpu.memory_space<vmem>>, vector<1x4xf32>
    %320 = vector.broadcast %319 : vector<1x4xf32> to vector<2x4xf32>
    %321 = arith.addf %318, %320 : vector<2x4xf32>
    %c0_50 = arith.constant 0 : index
    %c0_51 = arith.constant 0 : index
    %322 = vector.load %arg6[%c0_50, %c0_51] : memref<2x4xf32, #tpu.memory_space<vmem>>, vector<2x4xf32>
    tpu.vector_store %arg6[%c0_50, %c0_51], %321 {strides = array<i32>} : memref<2x4xf32, #tpu.memory_space<vmem>>, vector<2x4xf32>,
    %c0_52 = arith.constant 0 : index
    %c0_53 = arith.constant 0 : index
    %323 = vector.load %arg7[%c0_52, %c0_53] : memref<2x8xf32, #tpu.memory_space<vmem>>, vector<2x8xf32>
    tpu.vector_store %arg7[%c0_52, %c0_53], %282 {strides = array<i32>} : memref<2x8xf32, #tpu.memory_space<vmem>>, vector<2x8xf32>,
    return
  }
}

</mosaic_0001>

<bundles_post_ra>
// kernel: attention_model_forward.1
= control target key start
LH: loop header
LB: loop body
LE: loop exit
PB: predicated region body
PF: predicated region fallthrough
CT: control target
= control target key end

     0   :  { %13 = vsyncpa [#allocation3], 0  ;;  %v1357_v1 = vmov 0.0   ;;  %vm1358_vm0 = vmmov 0   ;;  %vm62_vm1 = vcmask 261120   ;;  %s1702_s0 = inlined_call_operand.vmem [shape: bf16[16,32], index: 0, kind: input, shape index: {}]   ;;  %s1703_s1 = inlined_call_operand.vmem [shape: bf16[32,128], index: 1, kind: input, shape index: {}]   ;;  %s1704_s2 = inlined_call_operand.vmem [shape: bf16[32,128], index: 2, kind: input, shape index: {}]   ;;  %s1705_s3 = inlined_call_operand.vmem [shape: f32[1,128], index: 3, kind: input, shape index: {}]   ;;  %s1706_s4 = inlined_call_operand.vmem [shape: bf16[32,4], index: 4, kind: input, shape index: {}]   ;;  %s1707_s5 = inlined_call_operand.vmem [shape: f32[1,4], index: 5, kind: input, shape index: {}]   ;;  %s1708_s6 = inlined_call_operand.hbm [shape: f32[2,4], index: 6, kind: output, shape index: {0}]   ;;  %s1709_s7 = inlined_call_operand.hbm [shape: f32[2,8], index: 7, kind: output, shape index: {1}]  }
   0x1   :  { %v1250_v0 = vld [vmem:[%s1703_s1] sm:$0xff]   ;;  %1147 = vmatprep.subr.bf16.mxu0 %v1357_v1  ;;  %1155 = vmatprep.subr.bf16.mxu1 %v1357_v1  ;;  %v1252_v3 = vld [vmem:[%s1703_s1 + $0x8] sm:$0xff]  }
   0x2   :  { %v1419_v2 = vld [vmem:[%s1704_s2] sm:$0xff]   ;;  %1148 = vmatpush3.bf16.msra.mxu0 %v1250_v0  ;;  %1151 = vmatprep.mubr.msk.bf16.mxu0 %vm1358_vm0, %v1357_v1  ;;  %v1431_v4 = vld [vmem:[%s1704_s2 + $0x8] sm:$0xff]  }
   0x3   :  { %1156 = vmatpush3.bf16.msra.mxu1 %v1419_v2  ;;  %1149 = vmatprep.subr.bf16.mxu0 %v1357_v1  ;;  %v1254_v5 = vld [vmem:[%s1702_s0] sm:$0xff]  }
   0x4   :  { %1157 = vmatprep.subr.bf16.mxu1 %v1357_v1  ;;  %1159 = vmatprep.mubr.msk.bf16.mxu1 %vm1358_vm0, %v1357_v1 }
   0x6   :  { %1150 = vmatpush3.bf16.msra.mxu0 %v1252_v3 }
   0x7   :  { %14 = vsyncpa [#allocation5], 0  ;;  %1158 = vmatpush3.bf16.msra.mxu1 %v1431_v4  ;;  %1163 = vmatprep.subr.bf16.mxu0 %v1357_v1  ;;  %v1359_v6 = vmov 0   ;;  %v107_v7 = vlaneseq  ;;  %v1083_v9 = vld [vmem:[%s1705_s3] ss:$0 sm:$0xff]  ;;  %s1360_s3 = smov 64  }
   0x8   :  { %1171 = vmatprep.subr.bf16.mxu1 %v1357_v1  ;;  %s1361_s10 = smov 32   ;;  %vm793_vm5 = vcmask 257026   ;;  %vm780_vm6 = vcmask 254976   ;;  %vm823_vm7 = vcmask 261126   ;;  %vm809_vm8 = vcmask 259076  }
   0x9   :  { %1152 = vmatmul.mubr.msk.bf16.vlgmr.msra.gmra.mrb[0].mxu0 %vm62_vm1, %v1254_v5  ;;  %v1456_v8 = vand.u32 127, %v107_v7 }
   0xa   :  { %1160 = vmatmul.mubr.bf16.vlgmr.msra.gmra.mrb[0].mxu1 %v1359_v6  ;;  %1164 = vmatpush3.bf16.msra.mxu0 %v1419_v2 }
   0xb   :  { %1165 = vmatprep.subr.bf16.mxu0 %v1357_v1  ;;  %1167 = vmatprep.mubr.msk.bf16.mxu0 %vm1358_vm0, %v1357_v1  ;;  %vm109_vm2 = vcmp.ge.s32.totalorder %v1456_v8, 64  ;;  %vm110_vm3 = vcmp.lt.s32.totalorder %v1456_v8, 96  ;;  %vm784_vm9 = vcmp.eq.s32.totalorder %v1456_v8, 0  ;;  %vm797_vm10 = vcmp.eq.s32.totalorder %v1456_v8, 1 }
   0xc   :  { %1172 = vmatpush3.bf16.msra.mxu1 %v1419_v2  ;;  %1175 = vmatprep.mubr.msk.bf16.mxu1 %vm1358_vm0, %v1357_v1  ;;  %vm1468_vm4 = vmand %vm109_vm2, %vm110_vm3  ;;  %vm813_vm11 = vcmp.eq.s32.totalorder %v1456_v8, 2  ;;  %vm827_vm12 = vcmp.eq.s32.totalorder %v1456_v8, 3  ;;  %vm840_vm13 = vcmp.eq.s32.totalorder %v1456_v8, 4  ;;  %vm853_vm14 = vcmp.eq.s32.totalorder %v1456_v8, 5 }
   0xd   :  { %1173 = vmatprep.subr.bf16.mxu1 %v1357_v1  ;;  %vm866_vm15 = vcmp.eq.s32.totalorder %v1456_v8, 6  ;;  %vm884_vm2 = vcmask 64518  }
   0xe   :  { %1166 = vmatpush3.bf16.msra.mxu0 %v1431_v4 }
   0xf   :  { %1179 = vmatprep.subr.bf16.mxu0 %v1357_v1 }
  0x10   :  { %1174 = vmatpush3.bf16.msra.mxu1 %v1431_v4 }
  0x11   :  { %1187 = vmatprep.subr.bf16.mxu1 %v1357_v1 }
  0xdc   :  { %v100_v10 = vpop.f32.mrb[0].mxu0 }
  0xdd   :  { %v1461_v11 = vadd.f32 %v1083_v9, %v100_v10  ;;  %v161_v12 = vpop.f32.mrb[0].mxu1  ;;  %v1153_v13 = vpop.f32.mrb[1].mxu0 }
  0xde   :  { %v1161_v14 = vpop.f32.mrb[1].mxu1  ;;  %v103_v15 = vpop.f32.mrb[2].mxu0 }
  0xdf   :  { %v167_v16 = vadd.f32 %v161_v12, %v1461_v11  ;;  %v1466_v17 = vadd.f32 %v1083_v9, %v103_v15  ;;  %v164_v18 = vpop.f32.mrb[2].mxu1  ;;  %v1154_v19 = vpop.f32.mrb[3].mxu0 }
  0xe0   :  { %v1162_v21 = vpop.f32.mrb[3].mxu1 }
  0xe1   :  { %v168_v22 = vadd.f32 %v167_v16, %v167_v16 }
  0xe3   :  { %v169_v23 = vsel %vm1468_vm4, %v168_v22, %v167_v16 }
  0xe4   :  { %v1090_v24 = vmul.f32 -1.442695, %v169_v23 }
  0xe6   :  { %1257 = vpow2.f32 %v1090_v24 }
  0xf0   :  { %v1258_v25 = vpop.eup %1257 }
  0xf1   :  { %v173_v26 = vadd.f32 1.0, %v1258_v25 }
  0xf3   :  { %1259 = vrcp.f32 %v173_v26 }
  0xfd   :  { %v1260_v27 = vpop.eup %1259 }
  0xfe   :  { %v176_v28 = vadd.f32 %v1260_v27, %v1260_v27 }
 0x100   :  { %v1091_v29 = vadd.f32 -1.0, %v176_v28 }
 0x102   :  { %v178_v30 = vsel %vm1468_vm4, %v1091_v29, %v1260_v27 }
 0x103   :  { %181 = vrot.lane.b32.xlu0 %v178_v30, %s1360_s3  ;;  %v179_v33 = vmul.f32 0.0, %v178_v30 }
 0x175   :  { %v182_v31 = vpop.permute.xlu0 %181 }
 0x176   :  { %v184_v32 = vmul.f32 %v182_v31, %v178_v30 }
 0x178   :  { %186 = vrot.lane.b32.xlu0 %v184_v32, %s1361_s10 }
 0x1ea   :  { %v187_v34 = vpop.permute.xlu0 %186 }
 0x1eb   :  { %v189_v35 = vadd.f32 %v187_v34, %v179_v33 }
 0x1ed   :  { %1261 = vtanh.f32 %v189_v35  ;;  %v259_v58 = vrot.slane %v189_v35, 6 }
 0x1f7   :  { %v1262_v36 = vpop.eup %1261 }
 0x1f8   :  { %192 = vrot.lane.b32.xlu1 %v1262_v36, %s1360_s3 }
 0x26a   :  { %v193_v37 = vpop.permute.xlu1 %192 }
 0x26b   :  { %v1479_v38 = vmul.f32 %v193_v37, %v178_v30 }
 0x26d   :  { %v196_v39 = vpack.c.bf16 %v1479_v38, %v1479_v38 }
 0x26f   :  { %198 = vrot.lane.b32.xlu1 %v196_v39, %s1361_s10 }
 0x2e1   :  { %v199_v40 = vpop.permute.xlu1 %198 }
 0x2e2   :  { %1168 = vmatmul.mubr.msk.bf16.vlgmr.msra.gmra.mrb[4].mxu0 %vm62_vm1, %v199_v40 }
 0x2e3   :  { %1180 = vmatpush3.bf16.msra.mxu0 %v1419_v2  ;;  %1183 = vmatprep.mubr.msk.bf16.mxu0 %vm1358_vm0, %v1357_v1 }
 0x2e4   :  { %1181 = vmatprep.subr.bf16.mxu0 %v1357_v1 }
 0x2e7   :  { %1182 = vmatpush3.bf16.msra.mxu0 %v1431_v4 }
 0x2e8   :  { %1195 = vmatprep.subr.bf16.mxu0 %v1357_v1 }
 0x3b5   :  { %v237_v41 = vpop.f32.mrb[4].mxu0 }
 0x3b6   :  { %v244_v42 = vrot.slane %v237_v41, 6  ;;  %v1169_v43 = vpop.f32.mrb[5].mxu0 }
 0x3b7   :  { %v240_v44 = vpop.f32.mrb[6].mxu0 }
 0x3b8   :  { %v246_v45 = vadd.f32 %v244_v42, %v1461_v11  ;;  %v1170_v46 = vpop.f32.mrb[7].mxu0 }
 0x3ba   :  { %v247_v47 = vadd.f32 %v246_v45, %v246_v45 }
 0x3bc   :  { %v248_v48 = vsel %vm1468_vm4, %v247_v47, %v246_v45 }
 0x3bd   :  { %v1093_v49 = vmul.f32 -1.442695, %v248_v48 }
 0x3bf   :  { %1263 = vpow2.f32 %v1093_v49 }
 0x3c9   :  { %v1264_v50 = vpop.eup %1263 }
 0x3ca   :  { %v252_v51 = vadd.f32 1.0, %v1264_v50 }
 0x3cc   :  { %1265 = vrcp.f32 %v252_v51 }
 0x3d6   :  { %v1266_v52 = vpop.eup %1265 }
 0x3d7   :  { %v255_v53 = vadd.f32 %v1266_v52, %v1266_v52 }
 0x3d9   :  { %v1094_v54 = vadd.f32 -1.0, %v255_v53 }
 0x3db   :  { %v257_v55 = vsel %vm1468_vm4, %v1094_v54, %v1266_v52 }
 0x3dc   :  { %263 = vrot.lane.b32.xlu0 %v257_v55, %s1360_s3  ;;  %v261_v59 = vmul.f32 %v259_v58, %v257_v55 }
 0x44e   :  { %v264_v56 = vpop.permute.xlu0 %263 }
 0x44f   :  { %v266_v57 = vmul.f32 %v264_v56, %v257_v55 }
 0x451   :  { %268 = vrot.lane.b32.xlu1 %v266_v57, %s1361_s10 }
 0x4c3   :  { %v269_v60 = vpop.permute.xlu1 %268 }
 0x4c4   :  { %v271_v61 = vadd.f32 %v269_v60, %v261_v59 }
 0x4c6   :  { %1267 = vtanh.f32 %v271_v61  ;;  %v342_v29 = vrot.slane %v271_v61, 6 }
 0x4d0   :  { %v1268_v62 = vpop.eup %1267 }
 0x4d1   :  { %274 = vrot.lane.b32.xlu0 %v1268_v62, %s1360_s3 }
 0x543   :  { %v275_v63 = vpop.permute.xlu0 %274 }
 0x544   :  { %v1499_v0 = vmul.f32 %v275_v63, %v257_v55 }
 0x546   :  { %v278_v3 = vpack.c.bf16 %v1499_v0, %v1499_v0 }
 0x548   :  { %v280_v5 = vrot.slane %v278_v3, 1 }
 0x54a   :  { %281 = vrot.lane.b32.xlu1 %v280_v5, %s1361_s10 }
 0x5bc   :  { %v282_v7 = vpop.permute.xlu1 %281 }
 0x5bd   :  { %1176 = vmatmul.mubr.msk.bf16.vlgmr.msra.gmra.mrb[4].mxu1 %vm62_vm1, %v282_v7 }
 0x5be   :  { %1188 = vmatpush3.bf16.msra.mxu1 %v1419_v2  ;;  %1191 = vmatprep.mubr.msk.bf16.mxu1 %vm1358_vm0, %v1357_v1 }
 0x5bf   :  { %1189 = vmatprep.subr.bf16.mxu1 %v1357_v1 }
 0x5c2   :  { %1190 = vmatpush3.bf16.msra.mxu1 %v1431_v4 }
 0x5c3   :  { %1203 = vmatprep.subr.bf16.mxu1 %v1357_v1 }
 0x690   :  { %v320_v9 = vpop.f32.mrb[4].mxu1 }
 0x691   :  { %v327_v10 = vrot.slane %v320_v9, 4  ;;  %v1177_v12 = vpop.f32.mrb[5].mxu1 }
 0x692   :  { %v323_v13 = vpop.f32.mrb[6].mxu1 }
 0x693   :  { %v329_v14 = vadd.f32 %v327_v10, %v1461_v11  ;;  %v1178_v15 = vpop.f32.mrb[7].mxu1 }
 0x695   :  { %v330_v16 = vadd.f32 %v329_v14, %v329_v14 }
 0x697   :  { %v331_v18 = vsel %vm1468_vm4, %v330_v16, %v329_v14 }
 0x698   :  { %v1096_v19 = vmul.f32 -1.442695, %v331_v18 }
 0x69a   :  { %1269 = vpow2.f32 %v1096_v19 }
 0x6a4   :  { %v1270_v21 = vpop.eup %1269 }
 0x6a5   :  { %v335_v22 = vadd.f32 1.0, %v1270_v21 }
 0x6a7   :  { %1271 = vrcp.f32 %v335_v22 }
 0x6b1   :  { %v1272_v23 = vpop.eup %1271 }
 0x6b2   :  { %v338_v24 = vadd.f32 %v1272_v23, %v1272_v23 }
 0x6b4   :  { %v1097_v25 = vadd.f32 -1.0, %v338_v24 }
 0x6b6   :  { %v340_v26 = vsel %vm1468_vm4, %v1097_v25, %v1272_v23 }
 0x6b7   :  { %346 = vrot.lane.b32.xlu0 %v340_v26, %s1360_s3  ;;  %v344_v30 = vmul.f32 %v342_v29, %v340_v26 }
 0x729   :  { %v347_v27 = vpop.permute.xlu0 %346 }
 0x72a   :  { %v349_v28 = vmul.f32 %v347_v27, %v340_v26 }
 0x72c   :  { %351 = vrot.lane.b32.xlu1 %v349_v28, %s1361_s10 }
 0x79e   :  { %v352_v31 = vpop.permute.xlu1 %351 }
 0x79f   :  { %v354_v32 = vadd.f32 %v352_v31, %v344_v30 }
 0x7a1   :  { %1273 = vtanh.f32 %v354_v32  ;;  %v425_v56 = vrot.slane %v354_v32, 6 }
 0x7ab   :  { %v1274_v33 = vpop.eup %1273 }
 0x7ac   :  { %357 = vrot.lane.b32.xlu0 %v1274_v33, %s1360_s3 }
 0x81e   :  { %v358_v34 = vpop.permute.xlu0 %357 }
 0x81f   :  { %v1519_v35 = vmul.f32 %v358_v34, %v340_v26 }
 0x821   :  { %v361_v36 = vpack.c.bf16 %v1519_v35, %v1519_v35 }
 0x823   :  { %v363_v37 = vrot.slane %v361_v36, 2 }
 0x825   :  { %364 = vrot.lane.b32.xlu1 %v363_v37, %s1361_s10 }
 0x897   :  { %v365_v39 = vpop.permute.xlu1 %364 }
 0x898   :  { %1184 = vmatmul.mubr.msk.bf16.vlgmr.msra.gmra.mrb[8].mxu0 %vm62_vm1, %v365_v39 }
 0x899   :  { %1196 = vmatpush3.bf16.msra.mxu0 %v1419_v2  ;;  %1199 = vmatprep.mubr.msk.bf16.mxu0 %vm1358_vm0, %v1357_v1 }
 0x89a   :  { %1197 = vmatprep.subr.bf16.mxu0 %v1357_v1 }
 0x89d   :  { %1198 = vmatpush3.bf16.msra.mxu0 %v1431_v4 }
 0x89e   :  { %1211 = vmatprep.subr.bf16.mxu0 %v1357_v1 }
 0x96b   :  { %v403_v40 = vpop.f32.mrb[8].mxu0 }
 0x96c   :  { %v410_v41 = vrot.slane %v403_v40, 2  ;;  %v1185_v42 = vpop.f32.mrb[9].mxu0 }
 0x96d   :  { %v406_v43 = vpop.f32.mrb[10].mxu0 }
 0x96e   :  { %v412_v44 = vadd.f32 %v410_v41, %v1461_v11  ;;  %v1186_v45 = vpop.f32.mrb[11].mxu0 }
 0x970   :  { %v413_v46 = vadd.f32 %v412_v44, %v412_v44 }
 0x972   :  { %v414_v47 = vsel %vm1468_vm4, %v413_v46, %v412_v44 }
 0x973   :  { %v1099_v48 = vmul.f32 -1.442695, %v414_v47 }
 0x975   :  { %1275 = vpow2.f32 %v1099_v48 }
 0x97f   :  { %v1276_v49 = vpop.eup %1275 }
 0x980   :  { %v418_v50 = vadd.f32 1.0, %v1276_v49 }
 0x982   :  { %1277 = vrcp.f32 %v418_v50 }
 0x98c   :  { %v1278_v51 = vpop.eup %1277 }
 0x98d   :  { %v421_v52 = vadd.f32 %v1278_v51, %v1278_v51 }
 0x98f   :  { %v1100_v53 = vadd.f32 -1.0, %v421_v52 }
 0x991   :  { %v423_v54 = vsel %vm1468_vm4, %v1100_v53, %v1278_v51 }
 0x992   :  { %429 = vrot.lane.b32.xlu0 %v423_v54, %s1360_s3  ;;  %v427_v57 = vmul.f32 %v425_v56, %v423_v54 }
 0xa04   :  { %v430_v55 = vpop.permute.xlu0 %429 }
 0xa05   :  { %v432_v11 = vmul.f32 %v430_v55, %v423_v54 }
 0xa07   :  { %434 = vrot.lane.b32.xlu1 %v432_v11, %s1361_s10 }
 0xa79   :  { %v435_v58 = vpop.permute.xlu1 %434 }
 0xa7a   :  { %v437_v59 = vadd.f32 %v435_v58, %v427_v57 }
 0xa7c   :  { %1279 = vtanh.f32 %v437_v59  ;;  %v505_v27 = vrot.slane %v437_v59, 6 }
 0xa86   :  { %v1280_v60 = vpop.eup %1279 }
 0xa87   :  { %440 = vrot.lane.b32.xlu0 %v1280_v60, %s1360_s3 }
 0xaf9   :  { %v441_v61 = vpop.permute.xlu0 %440 }
 0xafa   :  { %v1539_v62 = vmul.f32 %v441_v61, %v423_v54 }
 0xafc   :  { %v444_v63 = vpack.c.bf16 %v1539_v62, %v1539_v62 }
 0xafe   :  { %v446_v3 = vrot.slane %v444_v63, 3 }
 0xb00   :  { %447 = vrot.lane.b32.xlu1 %v446_v3, %s1361_s10 }
 0xb72   :  { %v448_v5 = vpop.permute.xlu1 %447 }
 0xb73   :  { %1192 = vmatmul.mubr.msk.bf16.vlgmr.msra.gmra.mrb[8].mxu1 %vm62_vm1, %v448_v5 }
 0xb74   :  { %1204 = vmatpush3.bf16.msra.mxu1 %v1419_v2  ;;  %1207 = vmatprep.mubr.msk.bf16.mxu1 %vm1358_vm0, %v1357_v1 }
 0xb75   :  { %1205 = vmatprep.subr.bf16.mxu1 %v1357_v1 }
 0xb78   :  { %1206 = vmatpush3.bf16.msra.mxu1 %v1431_v4 }
 0xb79   :  { %1219 = vmatprep.subr.bf16.mxu1 %v1357_v1 }
 0xc46   :  { %v486_v7 = vpop.f32.mrb[8].mxu1 }
 0xc47   :  { %v492_v9 = vadd.f32 %v486_v7, %v1466_v17  ;;  %v1193_v10 = vpop.f32.mrb[9].mxu1 }
 0xc48   :  { %v489_v12 = vpop.f32.mrb[10].mxu1 }
 0xc49   :  { %v493_v13 = vadd.f32 %v492_v9, %v492_v9  ;;  %v1194_v14 = vpop.f32.mrb[11].mxu1 }
 0xc4b   :  { %v494_v15 = vsel %vm1468_vm4, %v493_v13, %v492_v9 }
 0xc4c   :  { %v1102_v16 = vmul.f32 -1.442695, %v494_v15 }
 0xc4e   :  { %1281 = vpow2.f32 %v1102_v16 }
 0xc58   :  { %v1282_v18 = vpop.eup %1281 }
 0xc59   :  { %v498_v19 = vadd.f32 1.0, %v1282_v18 }
 0xc5b   :  { %1283 = vrcp.f32 %v498_v19 }
 0xc65   :  { %v1284_v21 = vpop.eup %1283 }
 0xc66   :  { %v501_v22 = vadd.f32 %v1284_v21, %v1284_v21 }
 0xc68   :  { %v1103_v23 = vadd.f32 -1.0, %v501_v22 }
 0xc6a   :  { %v503_v24 = vsel %vm1468_vm4, %v1103_v23, %v1284_v21 }
 0xc6b   :  { %509 = vrot.lane.b32.xlu0 %v503_v24, %s1360_s3  ;;  %v507_v28 = vmul.f32 %v505_v27, %v503_v24 }
 0xcdd   :  { %v510_v25 = vpop.permute.xlu0 %509 }
 0xcde   :  { %v512_v26 = vmul.f32 %v510_v25, %v503_v24 }
 0xce0   :  { %514 = vrot.lane.b32.xlu1 %v512_v26, %s1361_s10 }
 0xd52   :  { %v515_v29 = vpop.permute.xlu1 %514 }
 0xd53   :  { %v517_v30 = vadd.f32 %v515_v29, %v507_v28 }
 0xd55   :  { %1285 = vtanh.f32 %v517_v30  ;;  %v587_v53 = vrot.slane %v517_v30, 6 }
 0xd5f   :  { %v1286_v31 = vpop.eup %1285 }
 0xd60   :  { %520 = vrot.lane.b32.xlu0 %v1286_v31, %s1360_s3 }
 0xdd2   :  { %v521_v32 = vpop.permute.xlu0 %520 }
 0xdd3   :  { %v1559_v33 = vmul.f32 %v521_v32, %v503_v24 }
 0xdd5   :  { %v524_v34 = vpack.c.bf16 %v1559_v33, %v1559_v33 }
 0xdd7   :  { %526 = vrot.lane.b32.xlu1 %v524_v34, %s1361_s10 }
 0xe49   :  { %v527_v36 = vpop.permute.xlu1 %526 }
 0xe4a   :  { %1200 = vmatmul.mubr.msk.bf16.vlgmr.msra.gmra.mrb[12].mxu0 %vm62_vm1, %v527_v36 }
 0xe4b   :  { %1212 = vmatpush3.bf16.msra.mxu0 %v1419_v2  ;;  %1215 = vmatprep.mubr.msk.bf16.mxu0 %vm1358_vm0, %v1357_v1 }
 0xe4c   :  { %1213 = vmatprep.subr.bf16.mxu0 %v1357_v1 }
 0xe4f   :  { %1214 = vmatpush3.bf16.msra.mxu0 %v1431_v4 }
 0xf1d   :  { %v565_v37 = vpop.f32.mrb[12].mxu0 }
 0xf1e   :  { %v572_v39 = vrot.slane %v565_v37, 6  ;;  %v1201_v40 = vpop.f32.mrb[13].mxu0 }
 0xf1f   :  { %v568_v41 = vpop.f32.mrb[14].mxu0 }
 0xf20   :  { %v574_v42 = vadd.f32 %v572_v39, %v1466_v17  ;;  %v1202_v43 = vpop.f32.mrb[15].mxu0 }
 0xf22   :  { %v575_v44 = vadd.f32 %v574_v42, %v574_v42 }
 0xf24   :  { %v576_v45 = vsel %vm1468_vm4, %v575_v44, %v574_v42 }
 0xf25   :  { %v1105_v46 = vmul.f32 -1.442695, %v576_v45 }
 0xf27   :  { %1287 = vpow2.f32 %v1105_v46 }
 0xf31   :  { %v1288_v2 = vpop.eup %1287 }
 0xf32   :  { %v580_v47 = vadd.f32 1.0, %v1288_v2 }
 0xf34   :  { %1289 = vrcp.f32 %v580_v47 }
 0xf3e   :  { %v1290_v48 = vpop.eup %1289 }
 0xf3f   :  { %v583_v49 = vadd.f32 %v1290_v48, %v1290_v48 }
 0xf41   :  { %v1106_v50 = vadd.f32 -1.0, %v583_v49 }
 0xf43   :  { %v585_v4 = vsel %vm1468_vm4, %v1106_v50, %v1290_v48 }
 0xf44   :  { %591 = vrot.lane.b32.xlu0 %v585_v4, %s1360_s3  ;;  %v589_v54 = vmul.f32 %v587_v53, %v585_v4 }
 0xfb6   :  { %v592_v51 = vpop.permute.xlu0 %591 }
 0xfb7   :  { %v594_v52 = vmul.f32 %v592_v51, %v585_v4 }
 0xfb9   :  { %596 = vrot.lane.b32.xlu1 %v594_v52, %s1361_s10 }
0x102b   :  { %v597_v55 = vpop.permute.xlu1 %596 }
0x102c   :  { %v599_v11 = vadd.f32 %v597_v55, %v589_v54 }
0x102e   :  { %1291 = vtanh.f32 %v599_v11  ;;  %v670_v25 = vrot.slane %v599_v11, 6 }
0x1038   :  { %v1292_v56 = vpop.eup %1291 }
0x1039   :  { %602 = vrot.lane.b32.xlu0 %v1292_v56, %s1360_s3 }
0x10ab   :  { %v603_v57 = vpop.permute.xlu0 %602 }
0x10ac   :  { %v1578_v58 = vmul.f32 %v603_v57, %v585_v4 }
0x10ae   :  { %v606_v59 = vpack.c.bf16 %v1578_v58, %v1578_v58 }
0x10b0   :  { %v608_v60 = vrot.slane %v606_v59, 1 }
0x10b2   :  { %609 = vrot.lane.b32.xlu1 %v608_v60, %s1361_s10 }
0x1124   :  { %v610_v61 = vpop.permute.xlu1 %609 }
0x1125   :  { %1208 = vmatmul.mubr.msk.bf16.vlgmr.msra.gmra.mrb[12].mxu1 %vm62_vm1, %v610_v61 }
0x1126   :  { %1223 = vmatprep.mubr.msk.bf16.mxu1 %vm1358_vm0, %v1357_v1  ;;  %vm879_vm0 = vcmp.eq.s32.totalorder %v1456_v8, 7 }
0x11f8   :  { %v648_v63 = vpop.f32.mrb[12].mxu1 }
0x11f9   :  { %v655_v3 = vrot.slane %v648_v63, 4  ;;  %v1209_v5 = vpop.f32.mrb[13].mxu1 }
0x11fa   :  { %v651_v7 = vpop.f32.mrb[14].mxu1 }
0x11fb   :  { %v657_v9 = vadd.f32 %v655_v3, %v1466_v17  ;;  %v1210_v10 = vpop.f32.mrb[15].mxu1 }
0x11fd   :  { %v658_v12 = vadd.f32 %v657_v9, %v657_v9 }
0x11ff   :  { %v659_v13 = vsel %vm1468_vm4, %v658_v12, %v657_v9 }
0x1200   :  { %v1108_v14 = vmul.f32 -1.442695, %v659_v13 }
0x1202   :  { %1293 = vpow2.f32 %v1108_v14 }
0x120c   :  { %v1294_v15 = vpop.eup %1293 }
0x120d   :  { %v663_v16 = vadd.f32 1.0, %v1294_v15 }
0x120f   :  { %1295 = vrcp.f32 %v663_v16 }
0x1219   :  { %v1296_v18 = vpop.eup %1295 }
0x121a   :  { %v666_v19 = vadd.f32 %v1296_v18, %v1296_v18 }
0x121c   :  { %v1109_v21 = vadd.f32 -1.0, %v666_v19 }
0x121e   :  { %v668_v22 = vsel %vm1468_vm4, %v1109_v21, %v1296_v18 }
0x121f   :  { %674 = vrot.lane.b32.xlu0 %v668_v22, %s1360_s3  ;;  %v672_v26 = vmul.f32 %v670_v25, %v668_v22 }
0x1291   :  { %v675_v23 = vpop.permute.xlu0 %674 }
0x1292   :  { %v677_v24 = vmul.f32 %v675_v23, %v668_v22 }
0x1294   :  { %679 = vrot.lane.b32.xlu1 %v677_v24, %s1361_s10 }
0x1306   :  { %v680_v27 = vpop.permute.xlu1 %679 }
0x1307   :  { %v682_v28 = vadd.f32 %v680_v27, %v672_v26 }
0x1309   :  { %1297 = vtanh.f32 %v682_v28  ;;  %v753_v52 = vrot.slane %v682_v28, 6 }
0x1313   :  { %v1298_v29 = vpop.eup %1297 }
0x1314   :  { %685 = vrot.lane.b32.xlu0 %v1298_v29, %s1360_s3 }
0x1386   :  { %v686_v30 = vpop.permute.xlu0 %685 }
0x1387   :  { %v1594_v31 = vmul.f32 %v686_v30, %v668_v22 }
0x1389   :  { %v689_v32 = vpack.c.bf16 %v1594_v31, %v1594_v31 }
0x138b   :  { %v691_v34 = vrot.slane %v689_v32, 2 }
0x138d   :  { %692 = vrot.lane.b32.xlu1 %v691_v34, %s1361_s10 }
0x13ff   :  { %v693_v36 = vpop.permute.xlu1 %692 }
0x1400   :  { %1216 = vmatmul.mubr.msk.bf16.vlgmr.msra.gmra.mrb[16].mxu0 %vm62_vm1, %v693_v36 }
0x14d3   :  { %v731_v37 = vpop.f32.mrb[16].mxu0 }
0x14d4   :  { %v738_v39 = vrot.slane %v731_v37, 2  ;;  %v1217_v40 = vpop.f32.mrb[17].mxu0 }
0x14d5   :  { %v734_v41 = vpop.f32.mrb[18].mxu0 }
0x14d6   :  { %v740_v42 = vadd.f32 %v738_v39, %v1466_v17  ;;  %v1218_v43 = vpop.f32.mrb[19].mxu0 }
0x14d8   :  { %v741_v44 = vadd.f32 %v740_v42, %v740_v42 }
0x14da   :  { %v742_v45 = vsel %vm1468_vm4, %v741_v44, %v740_v42 }
0x14db   :  { %v1111_v46 = vmul.f32 -1.442695, %v742_v45 }
0x14dd   :  { %1299 = vpow2.f32 %v1111_v46 }
0x14e7   :  { %v1300_v2 = vpop.eup %1299 }
0x14e8   :  { %v746_v47 = vadd.f32 1.0, %v1300_v2 }
0x14ea   :  { %1301 = vrcp.f32 %v746_v47 }
0x14f4   :  { %v1302_v48 = vpop.eup %1301 }
0x14f5   :  { %v749_v49 = vadd.f32 %v1302_v48, %v1302_v48 }
0x14f7   :  { %v1112_v50 = vadd.f32 -1.0, %v749_v49 }
0x14f9   :  { %v751_v4 = vsel %vm1468_vm4, %v1112_v50, %v1302_v48 }
0x14fa   :  { %757 = vrot.lane.b32.xlu0 %v751_v4, %s1360_s3  ;;  %v755_v53 = vmul.f32 %v753_v52, %v751_v4 }
0x156c   :  { %v758_v51 = vpop.permute.xlu0 %757 }
0x156d   :  { %v760_v17 = vmul.f32 %v758_v51, %v751_v4 }
0x156f   :  { %762 = vrot.lane.b32.xlu1 %v760_v17, %s1361_s10 }
0x15e1   :  { %v763_v54 = vpop.permute.xlu1 %762 }
0x15e2   :  { %v765_v55 = vadd.f32 %v763_v54, %v755_v53 }
0x15e4   :  { %1303 = vtanh.f32 %v765_v55 }
0x15ee   :  { %v1304_v11 = vpop.eup %1303 }
0x15ef   :  { %768 = vrot.lane.b32.xlu0 %v1304_v11, %s1360_s3 }
0x1661   :  { %v769_v56 = vpop.permute.xlu0 %768 }
0x1662   :  { %v1608_v57 = vmul.f32 %v769_v56, %v751_v4 }
0x1664   :  { %v786_v20 = vrot.slane %v1608_v57, 4  ;;  %v773_v59 = vrot.slane %v1608_v57, 6  ;;  %v802_v63 = vrot.slane %v1608_v57, 2  ;;  %v818_v3 = vmul.f32 %v1608_v57, %v1539_v62 }
0x1665   :  { %v871_v10 = vmul.f32 %v1608_v57, %v1608_v57 }
0x1666   :  { %v788_v60 = vmul.f32 %v786_v20, %v1499_v0  ;;  %v775_v61 = vmul.f32 %v773_v59, %v1479_v38  ;;  %v804_v5 = vmul.f32 %v802_v63, %v1519_v35  ;;  %v845_v7 = vmul.f32 %v786_v20, %v1578_v58 }
0x1667   :  { %v832_v9 = vmul.f32 %v773_v59, %v1559_v33  ;;  %v858_v12 = vmul.f32 %v802_v63, %v1594_v31  ;;  %v1363_v63 = vmov 3  }
0x1668   :  { %790 = vrot.lane.b32.xlu0 %v788_v60, %s1361_s10  ;;  %777 = vrot.lane.b32.xlu1 %v775_v61, %s1361_s10  ;;  %v1362_v61 = vmov 7  }
0x1669   :  { %1242 = vset.pattern.permute.xlu1 %v1362_v61  ;;  %1241 = vset.pattern.permute.xlu0 %v1363_v63 }
0x166c   :  { %820 = vrot.lane.b32.xlu0 %v818_v3, %s1361_s10  ;;  %806 = vrot.lane.b32.xlu1 %v804_v5, %s1361_s10 }
0x1670   :  { %847 = vrot.lane.b32.xlu0 %v845_v7, %s1361_s10  ;;  %834 = vrot.lane.b32.xlu1 %v832_v9, %s1361_s10  ;;  %v902_v7 = vrot.slane %v1479_v38, 2  ;;  %v924_v9 = vrot.slane %v1519_v35, 6  ;;  %v1366_v38 = vmov 4   ;;  %v1367_v35 = vmov 5  }
0x1674   :  { %873 = vrot.lane.b32.xlu0 %v871_v10, %s1361_s10  ;;  %860 = vrot.lane.b32.xlu1 %v858_v12, %s1361_s10  ;;  %v913_v10 = vrot.slane %v1499_v0, 4  ;;  %v1364_v12 = vmov 1   ;;  %v967_v0 = vrot.slane %v1594_v31, 6  ;;  %v956_v31 = vrot.slane %v1578_v58, 4 }
0x16da   :  { %v791_v13 = vpop.permute.xlu0 %790  ;;  %v778_v14 = vpop.permute.xlu1 %777 }
0x16db   :  { %v794_v15 = vsel %vm793_vm5, %v791_v13, 0.0  ;;  %v781_v16 = vsel %vm780_vm6, %v778_v14, 0.0  ;;  %v1365_v13 = vmov 2   ;;  %v1368_v14 = vmov 6  }
0x16dc   :  { %795 = vadd.xlane.f32.xlu0 %v794_v15  ;;  %782 = vadd.xlane.f32.xlu1 %v781_v16  ;;  %v1255_v15 = vld [vmem:[%s1706_s4] sm:$0xff]  }
0x16dd   :  { %1220 = vmatpush3.bf16.msra.mxu1 %v1255_v15 }
0x16de   :  { %v821_v18 = vpop.permute.xlu0 %820  ;;  %v807_v19 = vpop.permute.xlu1 %806  ;;  %1221 = vmatprep.subr.bf16.mxu1 %v1357_v1 }
0x16df   :  { %v824_v21 = vsel %vm823_vm7, %v821_v18, 0.0  ;;  %v810_v22 = vsel %vm809_vm8, %v807_v19, 0.0 }
0x16e0   :  { %825 = vadd.xlane.f32.xlu1 %v824_v21  ;;  %811 = vadd.xlane.f32.xlu0 %v810_v22 }
0x16e2   :  { %v848_v23 = vpop.permute.xlu0 %847  ;;  %v835_v24 = vpop.permute.xlu1 %834 }
0x16e3   :  { %v850_v25 = vsel %vm793_vm5, %v848_v23, 0.0  ;;  %v837_v26 = vsel %vm780_vm6, %v835_v24, 0.0 }
0x16e4   :  { %851 = vadd.xlane.f32.xlu1 %v850_v25  ;;  %838 = vadd.xlane.f32.xlu0 %v837_v26 }
0x16e6   :  { %v874_v27 = vpop.permute.xlu0 %873  ;;  %v861_v28 = vpop.permute.xlu1 %860 }
0x16e7   :  { %v876_v29 = vsel %vm823_vm7, %v874_v27, 0.0  ;;  %v863_v30 = vsel %vm809_vm8, %v861_v28, 0.0 }
0x16e8   :  { %877 = vadd.xlane.f32.xlu1 %v876_v29  ;;  %864 = vadd.xlane.f32.xlu0 %v863_v30 }
0x1769   :  { %v796_v32 = vpop.xlane.xlu0 %795  ;;  %v783_v34 = vpop.xlane.xlu1 %782 }
0x176a   :  { %v785_v36 = vsel %vm784_vm9, %v783_v34, 0.0 }
0x176b   :  { %v799_v37 = vrot.slane %v785_v36, 6 }
0x176d   :  { %v801_v39 = vsel %vm797_vm10, %v796_v32, %v799_v37  ;;  %v812_v41 = vpop.xlane.xlu0 %811  ;;  %v826_v44 = vpop.xlane.xlu1 %825 }
0x176e   :  { %v815_v40 = vrot.slane %v801_v39, 6 }
0x1770   :  { %v817_v42 = vsel %vm813_vm11, %v812_v41, %v815_v40 }
0x1771   :  { %v829_v43 = vrot.slane %v817_v42, 6  ;;  %v839_v2 = vpop.xlane.xlu0 %838  ;;  %v852_v49 = vpop.xlane.xlu1 %851 }
0x1773   :  { %v831_v45 = vsel %vm827_vm12, %v826_v44, %v829_v43 }
0x1774   :  { %v842_v46 = vrot.slane %v831_v45, 6 }
0x1775   :  { %v865_v51 = vpop.xlane.xlu0 %864  ;;  %v878_v53 = vpop.xlane.xlu1 %877 }
0x1776   :  { %v844_v47 = vsel %vm840_vm13, %v839_v2, %v842_v46 }
0x1777   :  { %v855_v48 = vrot.slane %v844_v47, 6 }
0x1779   :  { %v857_v50 = vsel %vm853_vm14, %v852_v49, %v855_v48 }
0x177a   :  { %v868_v4 = vrot.slane %v857_v50, 6 }
0x177c   :  { %v870_v17 = vsel %vm866_vm15, %v865_v51, %v868_v4 }
0x177d   :  { %v881_v52 = vrot.slane %v870_v17, 6 }
0x177f   :  { %v883_v54 = vsel %vm879_vm0, %v878_v53, %v881_v52 }
0x1780   :  { %v885_v55 = vsel %vm884_vm2, %v883_v54, -inf }
0x1781   :  { %886 = vmax.xlane.f32.xlu0 %v885_v55 }
0x180e   :  { %v887_v11 = vpop.xlane.xlu0 %886 }
0x180f   :  { %v888_v56 = vsub.f32 %v883_v54, %v887_v11 }
0x1811   :  { %v889_v20 = vmul.f32 1.442695, %v888_v56 }
0x1813   :  { %1305 = vpow2.f32 %v889_v20 }
0x181d   :  { %v1306_v59 = vpop.eup %1305 }
0x181e   :  { %v891_v60 = vsel %vm884_vm2, %v1306_v59, 0.0 }
0x181f   :  { %892 = vadd.xlane.f32.xlu1 %v891_v60 }
0x18ac   :  { %v893_v8 = vpop.xlane.xlu1 %892 }
0x18ad   :  { %1307 = vrcp.f32 %v893_v8 }
0x18b7   :  { %v1308_v3 = vpop.eup %1307 }
0x18b8   :  { %v895_v5 = vmul.f32 %v1308_v3, %v1306_v59 }
0x18ba   :  { %1054 = vst.msk [vmem:[#allocation4 - $0x6] sm:$0xc0] %vm884_vm2, %v895_v5  ;;  %974 = vperm.xlu1 %1242, %v895_v5   ;;  %931 = vperm.xlu0 %1241, %v895_v5  }
0x18be   :  { %903 = vrot.lane.b32.xlu1 %v902_v7, %s1361_s10  ;;  %925 = vrot.lane.b32.xlu0 %v924_v9, %s1361_s10 }
0x18bf   :  { %1243 = vset.pattern.permute.xlu1 %v1359_v6  ;;  %1249 = vset.pattern.permute.xlu0 %v1362_v61  ;;  %v945_v6 = vrot.slane %v1559_v33, 2  ;;  %v1256_v33 = vld [vmem:[%s1706_s4 + $0x8] sm:$0xff]   ;;  %s1369_s4 = smov [#allocation4]  }
0x18c0   :  { %1222 = vmatpush3.bf16.msra.mxu1 %v1256_v33  ;;  %s1071_s15 = sshll.u32 %s1369_s4, 4  ;;  %s1072_s15 = int_to_ptr.vmem [resolvable:$true] %s1071_s15 }
0x18c1   :  { %s1309_s16 = scalar_lea.vmem %s1072_s15, 32  ;;  %p1314_p1 = scmp.lt.s32.totalorder %s1072_s15, %s1072_s15 }
0x18c2   :  { %914 = vrot.lane.b32.xlu1 %v913_v10, %s1361_s10  ;;  %p1310_p0 = scmp.ne.s32.totalorder %s1072_s15, %s1309_s16  ;;  %p1315_p2 = scmp.lt.s32.totalorder %s1309_s16, %s1309_s16 }
0x18c4   :  { %p1316_p3 = por %p1315_p2, %p1314_p1 }
0x18c6   :  { %898 = vperm.xlu1 %1243, %v895_v5   ;;  %p1317_p4 = pnand %p1316_p3, %p1310_p0 }
0x18ca   :  { %1244 = vset.pattern.permute.xlu1 %v1364_v12 }
0x18cb   :  { %909 = vperm.xlu1 %1244, %v895_v5  }
0x18cf   :  { %1245 = vset.pattern.permute.xlu1 %v1365_v13 }
0x18d0   :  { %920 = vperm.xlu1 %1245, %v895_v5  }
0x18d4   :  { %1246 = vset.pattern.permute.xlu1 %v1366_v38 }
0x18d5   :  { %941 = vperm.xlu1 %1246, %v895_v5  }
0x18d9   :  { %1247 = vset.pattern.permute.xlu1 %v1367_v35 }
0x18da   :  { %952 = vperm.xlu1 %1247, %v895_v5  }
0x18de   :  { %1248 = vset.pattern.permute.xlu1 %v1368_v14 }
0x18df   :  { %963 = vperm.xlu1 %1248, %v895_v5  }
0x18e3   :  { %946 = vrot.lane.b32.xlu1 %v945_v6, %s1361_s10 }
0x18e7   :  { %968 = vrot.lane.b32.xlu1 %v967_v0, %s1361_s10 }
0x1939   :  { %v932_v16 = vpop.permute.xlu0 %931  ;;  %v975_v19 = vpop.permute.xlu1 %974 }
0x193a   :  { %v934_v18 = vmul.f32 %v932_v16, %v1539_v62  ;;  %v977_v21 = vmul.f32 %v975_v19, %v1608_v57 }
0x193c   :  { %936 = vrot.lane.b32.xlu0 %v934_v18, %s1361_s10 }
0x193d   :  { %v904_v22 = vpop.permute.xlu1 %903  ;;  %v926_v29 = vpop.permute.xlu0 %925 }
0x1940   :  { %957 = vrot.lane.b32.xlu0 %v956_v31, %s1361_s10 }
0x1941   :  { %v915_v62 = vpop.permute.xlu1 %914 }
0x1944   :  { %979 = vrot.lane.b32.xlu0 %v977_v21, %s1361_s10 }
0x1945   :  { %v899_v23 = vpop.permute.xlu1 %898 }
0x1946   :  { %v906_v30 = vmul.f32 %v904_v22, %v899_v23 }
0x194a   :  { %v910_v1 = vpop.permute.xlu1 %909 }
0x194b   :  { %v917_v28 = vmul.f32 %v915_v62, %v910_v1 }
0x194d   :  { %v918_v58 = vadd.f32 %v917_v28, %v906_v30 }
0x194f   :  { %v921_v24 = vpop.permute.xlu1 %920 }
0x1950   :  { %v928_v32 = vmul.f32 %v926_v29, %v921_v24 }
0x1952   :  { %v929_v36 = vadd.f32 %v928_v32, %v918_v58 }
0x1954   :  { %v942_v25 = vpop.permute.xlu1 %941 }
0x1959   :  { %v953_v26 = vpop.permute.xlu1 %952 }
0x195e   :  { %v964_v27 = vpop.permute.xlu1 %963 }
0x1962   :  { %v947_v34 = vpop.permute.xlu1 %946 }
0x1963   :  { %v949_v57 = vmul.f32 %v947_v34, %v942_v25 }
0x1966   :  { %v969_v40 = vpop.permute.xlu1 %968 }
0x1967   :  { %v971_v44 = vmul.f32 %v969_v40, %v964_v27 }
0x19ae   :  { %v937_v37 = vpop.permute.xlu0 %936 }
0x19af   :  { %v939_v39 = vadd.f32 %v937_v37, %v929_v36 }
0x19b1   :  { %v950_v42 = vadd.f32 %v949_v57, %v939_v39 }
0x19b2   :  { %v958_v41 = vpop.permute.xlu0 %957 }
0x19b3   :  { %v960_v43 = vmul.f32 %v958_v41, %v953_v26 }
0x19b5   :  { %v961_v45 = vadd.f32 %v960_v43, %v950_v42 }
0x19b6   :  { %v980_v2 = vpop.permute.xlu0 %979 }
0x19b7   :  { %v972_v46 = vadd.f32 %v971_v44, %v961_v45 }
0x19b9   :  { %v982_v47 = vadd.f32 %v980_v2, %v972_v46 }
0x19bb   :  { %v983_v48 = vpack.c.bf16 %v982_v47, %v982_v47 }
0x19bd   :  { %v996_v49 = vrot.slane %v983_v48, 3 }
0x19bf   :  { %1224 = vmatmul.mubr.msk.bf16.vlgmr.msra.gmra.mrb[16].mxu1 %vm62_vm1, %v996_v49 }
0x19c0   :  { %1320 = shalt.err (!%p1317_p4)
}
0x19c1   :  { %s1321_s19 = scalar_lea.hbm %s1709_s7, 32 }
0x19c2   :  { %p1322_p5 = scmp.ne.s32.totalorder %s1709_s7, %s1321_s19  ;;  %p1325_p6 = scmp.lt.u32.totalorder %s1321_s19, %s1709_s7 }
0x19c4   :  { %p1327_p7 = pnand %p1325_p6, %p1322_p5 }
0x19c6   :  { %1330 = shalt.err (!%p1327_p7)
}
0x19c7   :  { %1074 = dma.vmem_to_hbm [thread:$0]  %s1072_s15, 32, %s1709_s7, [#allocation5]   ;;  %v1113_v50 = vld [vmem:[%s1707_s5] ss:$0 sm:$0xff]  ;;  %vm1052_vm1 = vcmask 25600  }
0x19c8   :  { %s1370_s28 = smov [#allocation2]  }
0x19c9   :  { %s1061_s29 = sshll.u32 %s1370_s28, 4  ;;  %s1062_s29 = int_to_ptr.vmem [resolvable:$true] %s1061_s29 }
0x19ca   :  { %s1331_s30 = scalar_lea.vmem %s1062_s29, 32  ;;  %p1336_p9 = scmp.lt.s32.totalorder %s1062_s29, %s1062_s29 }
0x19cb   :  { %p1332_p8 = scmp.ne.s32.totalorder %s1062_s29, %s1331_s30  ;;  %p1337_p10 = scmp.lt.s32.totalorder %s1331_s30, %s1331_s30 }
0x19cd   :  { %p1338_p11 = por %p1337_p10, %p1336_p9 }
0x19cf   :  { %p1339_p12 = pnand %p1338_p11, %p1332_p8 }
0x1a92   :  { %v1046_v4 = vpop.f32.mrb[16].mxu1 }
0x1a93   :  { %v1047_v51 = vadd.f32 %v1113_v50, %v1046_v4  ;;  %v1225_v17 = vpop.f32.mrb[17].mxu1 }
0x1a94   :  { %v1049_v52 = vpop.f32.mrb[18].mxu1 }
0x1a95   :  { %v1226_v53 = vpop.f32.mrb[19].mxu1  ;;  %1053 = vst.msk [vmem:[#allocation2] sm:$0x3] %vm1052_vm1, %v1047_v51 }
0x1a96   :  { %1342 = shalt.err (!%p1339_p12)
}
0x1a97   :  { %s1343_s5 = scalar_lea.hbm %s1708_s6, 32 }
0x1a98   :  { %p1344_p13 = scmp.ne.s32.totalorder %s1708_s6, %s1343_s5  ;;  %p1347_p0 = scmp.lt.u32.totalorder %s1343_s5, %s1708_s6 }
0x1a9a   :  { %p1349_p1 = pnand %p1347_p0, %p1344_p13 }
0x1a9c   :  { %1352 = shalt.err (!%p1349_p1)
}
0x1a9d   :  { %1064 = dma.vmem_to_hbm [thread:$0]  %s1062_s29, 32, %s1708_s6, [#allocation3]  }
0x1a9e   :  { %1353 = dma.done.wait [#allocation3], 32  }
0x1a9f   :  { %1354 = vsyncadd [#allocation3], 4294967264 }
0x1aa0   :  { %1355 = dma.done.wait [#allocation5], 32  }
0x1aa1   :  { %1356 = vsyncadd [#allocation5], 4294967264 }
0x1aa2   :  { %1081 = vsyncpa [#allocation3], 1 }
0x1aa3   :  { %1082 = vsyncpa [#allocation5], 1 }

</bundles_post_ra>
